<compile_context>
chip_gen: v7x
topology: tpu7x:2x2x1
jax: 0.10.0
libtpu: 0.0.40
codegen_flags: <defaults>
</compile_context>

<pallas_src>
import functools

import jax
import jax.numpy as jnp
from jax.experimental import pallas as pl
from jax.experimental.pallas import tpu as pltpu

BN_EPS = 1e-5
LANE = 128
NEG_INF = -1e30


def _round_up(x, m):
    return ((x + m - 1) // m) * m


def _fusion_kernel(x_ref, w_big_ref, b_big_ref, wa2_ref, ba2_ref,
                   wc1_ref, bc1_ref, wc2_ref, bc2_ref,
                   out_ref, attn_ref, *, num_models, hidden_dim):
    n, H = num_models, hidden_dim
    nH = n * H

    x = x_ref[...]                                                     # (TB, sum(D_i))

    # --- fused per-model projection + attention-layer-1 (one block-diag matmul) ---
    y = jnp.dot(x, w_big_ref[...], preferred_element_type=jnp.float32) + b_big_ref[...]
    proj_all = y[:, :nH]                                               # [p_0 | ... | p_{n-1}]
    h_all = jnp.maximum(y[:, nH:], 0.0)                                # attention hidden (ReLU)

    # --- attention logits: one block-diagonal MXU dot, lane-padded to 128 ----------
    logits = (jnp.dot(h_all, wa2_ref[...], preferred_element_type=jnp.float32)
              + ba2_ref[...])                                          # (TB, 128); lanes >= n are -1e30

    # --- softmax over models (padded lanes contribute exp(-1e30) == 0) -------------
    m = jnp.max(logits, axis=1, keepdims=True)
    e = jnp.exp(logits - m)
    w = e / jnp.sum(e, axis=1, keepdims=True)                          # (TB, 128)
    attn_ref[...] = w                                                  # lane-dense store

    # --- attention-weighted fusion --------------------------------------------------
    fused = w[:, 0:1] * proj_all[:, :H]
    for i in range(1, n):
        fused = fused + w[:, i:i + 1] * proj_all[:, i * H:(i + 1) * H]

    # --- classifier: Linear -> ReLU -> (BatchNorm folded into wc2/bc2) -> Linear ----
    h1 = jnp.dot(fused, wc1_ref[...], preferred_element_type=jnp.float32) + bc1_ref[...]
    h1 = jnp.maximum(h1, 0.0)
    out_ref[...] = (jnp.dot(h1, wc2_ref[...], preferred_element_type=jnp.float32)
                    + bc2_ref[...])                                    # (TB, 128) lane-dense


def attention_fusion_pallas(embeddings, params, num_classes, *, tile_batch=512):
    """embeddings: list of (B, D_i) f32 arrays. Returns (logits (B,C), attn_weights (B,n))."""
    n = len(embeddings)
    B = embeddings[0].shape[0]
    dims = [int(e.shape[1]) for e in embeddings]
    d_sum = sum(dims)
    H = params["wp"][0].shape[1]
    nH = n * H

    # ---------- pack per-model params into a few dense arrays (plain JAX) ----------
    w_big = jnp.zeros((d_sum, 2 * nH), jnp.float32)
    b_big = jnp.zeros((1, 2 * nH), jnp.float32)
    off = 0
    for i, d in enumerate(dims):
        w_big = w_big.at[off:off + d, i * H:(i + 1) * H].set(params["wp"][i])
        w_big = w_big.at[off:off + d, nH + i * H:nH + (i + 1) * H].set(params["wa1"][i])
        b_big = b_big.at[:, i * H:(i + 1) * H].set(params["bp"][i])
        b_big = b_big.at[:, nH + i * H:nH + (i + 1) * H].set(params["ba1"][i])
        off += d

    wa2_big = jnp.zeros((nH, LANE), jnp.float32)
    ba2_pad = jnp.full((1, LANE), NEG_INF, jnp.float32)
    for i in range(n):
        wa2_big = wa2_big.at[i * H:(i + 1) * H, i].set(params["wa2"][i][0])
        ba2_pad = ba2_pad.at[0, i].set(params["ba2"][i][0, 0])

    # ---------- fold eval-mode BatchNorm into the final Linear ---------------------
    scale = params["gamma"] * jax.lax.rsqrt(params["bn_var"] + BN_EPS)   # (1, H)
    shift = params["beta"] - scale * params["bn_mean"]                   # (1, H)
    wc2_fold = scale.reshape(H, 1) * params["wc2"]                       # (H, C)
    bc2_fold = shift @ params["wc2"] + params["bc2"]                     # (1, C)
    wc2_pad = jnp.zeros((H, LANE), jnp.float32).at[:, :num_classes].set(wc2_fold)
    bc2_pad = jnp.zeros((1, LANE), jnp.float32).at[:, :num_classes].set(bc2_fold)

    wc1 = params["wc1"]
    bc1 = params["bc1"]

    # ---------- batch tiling / padding ----------------------------------------------
    TB = min(tile_batch, _round_up(B, 8))       # multiple of 8, capped for small batches
    B_pad = _round_up(B, TB)
    x = jnp.concatenate(embeddings, axis=1)     # (B, sum(D_i))
    if B_pad != B:
        x = jnp.pad(x, ((0, B_pad - B), (0, 0)))

    grid = (B_pad // TB,)

    def const_spec(shape):
        return pl.BlockSpec(shape, lambda b: (0, 0))

    in_specs = [
        pl.BlockSpec((TB, d_sum), lambda b: (b, 0)),   # streamed embeddings
        const_spec(w_big.shape), const_spec(b_big.shape),
        const_spec(wa2_big.shape), const_spec(ba2_pad.shape),
        const_spec(wc1.shape), const_spec(bc1.shape),
        const_spec(wc2_pad.shape), const_spec(bc2_pad.shape),
    ]
    out_specs = (
        pl.BlockSpec((TB, LANE), lambda b: (b, 0)),
        pl.BlockSpec((TB, LANE), lambda b: (b, 0)),
    )
    out_shape = (
        jax.ShapeDtypeStruct((B_pad, LANE), jnp.float32),
        jax.ShapeDtypeStruct((B_pad, LANE), jnp.float32),
    )

    kernel = functools.partial(_fusion_kernel, num_models=n, hidden_dim=H)
    out_pad, attn_pad = pl.pallas_call(
        kernel,
        grid=grid,
        in_specs=in_specs,
        out_specs=out_specs,
        out_shape=out_shape,
        compiler_params=pltpu.CompilerParams(
            dimension_semantics=("parallel",),
            vmem_limit_bytes=32 * 1024 * 1024,
        ),
    )(x, w_big, b_big, wa2_big, ba2_pad, wc1, bc1, wc2_pad, bc2_pad)

    return out_pad[:B, :num_classes], attn_pad[:B, :n]


def init_params(key, model_dims, hidden_dim, num_classes):
    """Deterministic synthetic parameters. All Linear weights stored as (in, out)."""
    params = {"wp": [], "bp": [], "wa1": [], "ba1": [], "wa2": [], "ba2": []}
    keys = jax.random.split(key, 6 * len(model_dims) + 8)
    k_iter = iter(keys)

    def dense(k, shape, scale=0.1):
        return jax.random.normal(k, shape, dtype=jnp.float32) * scale

    for d in model_dims:
        params["wp"].append(dense(next(k_iter), (d, hidden_dim)))
        params["bp"].append(dense(next(k_iter), (1, hidden_dim)))
        params["wa1"].append(dense(next(k_iter), (d, hidden_dim)))
        params["ba1"].append(dense(next(k_iter), (1, hidden_dim)))
        params["wa2"].append(dense(next(k_iter), (1, hidden_dim)))   # Linear(H,1) weight, row vec
        params["ba2"].append(dense(next(k_iter), (1, 1)))

    params["wc1"] = dense(next(k_iter), (hidden_dim, hidden_dim))
    params["bc1"] = dense(next(k_iter), (1, hidden_dim))
    params["wc2"] = dense(next(k_iter), (hidden_dim, num_classes))
    params["bc2"] = dense(next(k_iter), (1, num_classes))
    # BatchNorm1d eval-mode stats / affine (non-trivial values to exercise the fold)
    params["gamma"] = 1.0 + dense(next(k_iter), (1, hidden_dim))
    params["beta"] = dense(next(k_iter), (1, hidden_dim))
    params["bn_mean"] = dense(next(k_iter), (1, hidden_dim))
    params["bn_var"] = 1.0 + jnp.abs(dense(next(k_iter), (1, hidden_dim)))
    return params


def reference_forward(embeddings, params):
    """Pure-JAX reference mirroring the PyTorch forward (eval mode)."""
    n = len(embeddings)
    projs = [embeddings[i] @ params["wp"][i] + params["bp"][i] for i in range(n)]
    logits = []
    for i in range(n):
        h = jnp.maximum(embeddings[i] @ params["wa1"][i] + params["ba1"][i], 0.0)
        logits.append(jnp.sum(h * params["wa2"][i], axis=1, keepdims=True) + params["ba2"][i])
    logit_mat = jnp.concatenate(logits, axis=1)
    w = jax.nn.softmax(logit_mat, axis=1)
    fused = sum(w[:, i:i + 1] * projs[i] for i in range(n))
    h1 = jnp.maximum(fused @ params["wc1"] + params["bc1"], 0.0)
    h1 = (params["gamma"] * (h1 - params["bn_mean"])
          * jax.lax.rsqrt(params["bn_var"] + BN_EPS) + params["beta"])
    out = h1 @ params["wc2"] + params["bc2"]
    return out, w


if __name__ == "__main__":
    model_dims = [16, 24, 32]
    hidden_dim = 32
    num_classes = 2
    batch = 4

    key = jax.random.PRNGKey(0)
    k_params, *k_embs = jax.random.split(key, 1 + len(model_dims))

    params = init_params(k_params, model_dims, hidden_dim, num_classes)
    embeddings = [jax.random.normal(k_embs[i], (batch, model_dims[i]), dtype=jnp.float32)
                  for i in range(len(model_dims))]

    out, attn = attention_fusion_pallas(embeddings, params, num_classes)
    out, attn = jax.block_until_ready((out, attn))

    ref_out, ref_attn = reference_forward(embeddings, params)
    assert out.shape == (batch, num_classes) and attn.shape == (batch, len(model_dims))
    assert jnp.allclose(out, ref_out, rtol=1e-4, atol=1e-4), "logits mismatch"
    assert jnp.allclose(attn, ref_attn, rtol=1e-4, atol=1e-4), "attention weights mismatch"

    print("KERNEL_OK")
</pallas_src>

<mosaic_0001>
module attributes {stable_mosaic.version = 11 : i64} {
  func.func @_fusion_kernel(%arg0: i32, %arg1: memref<8x72xf32, #tpu.memory_space<vmem>>, %arg2: memref<72x192xf32, #tpu.memory_space<vmem>>, %arg3: memref<1x192xf32, #tpu.memory_space<vmem>>, %arg4: memref<96x128xf32, #tpu.memory_space<vmem>>, %arg5: memref<1x128xf32, #tpu.memory_space<vmem>>, %arg6: memref<32x32xf32, #tpu.memory_space<vmem>>, %arg7: memref<1x32xf32, #tpu.memory_space<vmem>>, %arg8: memref<32x128xf32, #tpu.memory_space<vmem>>, %arg9: memref<1x128xf32, #tpu.memory_space<vmem>>, %arg10: memref<8x128xf32, #tpu.memory_space<vmem>>, %arg11: memref<8x128xf32, #tpu.memory_space<vmem>>) attributes {dimension_semantics = [#tpu.dimension_semantics<parallel>], iteration_bounds = array<i64: 1>, scalar_prefetch = 0 : i64, scratch_operands = 0 : i64, tpu.core_type = #tpu.core_type<tc>, window_params = [{transform_indices = @transform_0, window_bounds = array<i64: 8, 72>}, {pipeline_mode = #tpu.pipeline_mode<synchronous>, transform_indices = @transform_1, window_bounds = array<i64: 72, 192>}, {pipeline_mode = #tpu.pipeline_mode<synchronous>, transform_indices = @transform_2, window_bounds = array<i64: 1, 192>}, {pipeline_mode = #tpu.pipeline_mode<synchronous>, transform_indices = @transform_3, window_bounds = array<i64: 96, 128>}, {pipeline_mode = #tpu.pipeline_mode<synchronous>, transform_indices = @transform_4, window_bounds = array<i64: 1, 128>}, {pipeline_mode = #tpu.pipeline_mode<synchronous>, transform_indices = @transform_5, window_bounds = array<i64: 32, 32>}, {pipeline_mode = #tpu.pipeline_mode<synchronous>, transform_indices = @transform_6, window_bounds = array<i64: 1, 32>}, {pipeline_mode = #tpu.pipeline_mode<synchronous>, transform_indices = @transform_7, window_bounds = array<i64: 32, 128>}, {pipeline_mode = #tpu.pipeline_mode<synchronous>, transform_indices = @transform_8, window_bounds = array<i64: 1, 128>}, {transform_indices = @transform_9, window_bounds = array<i64: 8, 128>}, {transform_indices = @transform_10, window_bounds = array<i64: 8, 128>}]} {
    %c0 = arith.constant 0 : index
    %c0_0 = arith.constant 0 : index
    %0 = vector.load %arg1[%c0, %c0_0] : memref<8x72xf32, #tpu.memory_space<vmem>>, vector<8x72xf32>
    %c0_1 = arith.constant 0 : index
    %c0_2 = arith.constant 0 : index
    %1 = vector.load %arg2[%c0_1, %c0_2] : memref<72x192xf32, #tpu.memory_space<vmem>>, vector<72x192xf32>
    %cst = arith.constant dense<0.000000e+00> : vector<8x192xf32>
    %2 = tpu.matmul %0, %1, %cst {dimension_numbers = #tpu.dot_dimension_numbers<[1], [0], [0], [1], [0, 0, 1, 1], [], []>} : vector<8x72xf32>, vector<72x192xf32>, vector<8x192xf32> -> vector<8x192xf32>
    %c0_3 = arith.constant 0 : index
    %c0_4 = arith.constant 0 : index
    %3 = vector.load %arg3[%c0_3, %c0_4] : memref<1x192xf32, #tpu.memory_space<vmem>>, vector<1x192xf32>
    %4 = vector.broadcast %3 : vector<1x192xf32> to vector<8x192xf32>
    %5 = arith.addf %2, %4 : vector<8x192xf32>
    %6 = vector.extract_strided_slice %5 {offsets = [0, 0], sizes = [8, 96], strides = [1, 1]} : vector<8x192xf32> to vector<8x96xf32>
    %7 = vector.extract_strided_slice %5 {offsets = [0, 96], sizes = [8, 96], strides = [1, 1]} : vector<8x192xf32> to vector<8x96xf32>
    %cst_5 = arith.constant 0.000000e+00 : f32
    %8 = vector.broadcast %cst_5 : f32 to vector<8x96xf32>
    %9 = arith.maximumf %7, %8 : vector<8x96xf32>
    %c0_6 = arith.constant 0 : index
    %c0_7 = arith.constant 0 : index
    %10 = vector.load %arg4[%c0_6, %c0_7] : memref<96x128xf32, #tpu.memory_space<vmem>>, vector<96x128xf32>
    %cst_8 = arith.constant dense<0.000000e+00> : vector<8x128xf32>
    %11 = tpu.matmul %9, %10, %cst_8 {dimension_numbers = #tpu.dot_dimension_numbers<[1], [0], [0], [1], [0, 0, 1, 1], [], []>} : vector<8x96xf32>, vector<96x128xf32>, vector<8x128xf32> -> vector<8x128xf32>
    %c0_9 = arith.constant 0 : index
    %c0_10 = arith.constant 0 : index
    %12 = vector.load %arg5[%c0_9, %c0_10] : memref<1x128xf32, #tpu.memory_space<vmem>>, vector<1x128xf32>
    %13 = vector.broadcast %12 : vector<1x128xf32> to vector<8x128xf32>
    %14 = arith.addf %11, %13 : vector<8x128xf32>
    %cst_11 = arith.constant dense<0xFF800000> : vector<8xf32>
    %15 = vector.multi_reduction <maximumf>, %14, %cst_11 [1] : vector<8x128xf32> to vector<8xf32>
    %16 = vector.shape_cast %15 : vector<8xf32> to vector<8x1xf32>
    %17 = vector.broadcast %16 : vector<8x1xf32> to vector<8x128xf32>
    %18 = arith.subf %14, %17 : vector<8x128xf32>
    %19 = math.exp %18 : vector<8x128xf32>
    %cst_12 = arith.constant dense<0.000000e+00> : vector<8xf32>
    %20 = vector.multi_reduction <add>, %19, %cst_12 [1] : vector<8x128xf32> to vector<8xf32>
    %21 = vector.shape_cast %20 : vector<8xf32> to vector<8x1xf32>
    %22 = vector.broadcast %21 : vector<8x1xf32> to vector<8x128xf32>
    %23 = arith.divf %19, %22 : vector<8x128xf32>
    %c0_13 = arith.constant 0 : index
    %c0_14 = arith.constant 0 : index
    %24 = vector.load %arg11[%c0_13, %c0_14] : memref<8x128xf32, #tpu.memory_space<vmem>>, vector<8x128xf32>
    tpu.vector_store %arg11[%c0_13, %c0_14], %23 {strides = array<i32>} : memref<8x128xf32, #tpu.memory_space<vmem>>, vector<8x128xf32>,
    %25 = vector.extract_strided_slice %23 {offsets = [0, 0], sizes = [8, 1], strides = [1, 1]} : vector<8x128xf32> to vector<8x1xf32>
    %26 = vector.extract_strided_slice %6 {offsets = [0, 0], sizes = [8, 32], strides = [1, 1]} : vector<8x96xf32> to vector<8x32xf32>
    %27 = vector.broadcast %25 : vector<8x1xf32> to vector<8x32xf32>
    %28 = arith.mulf %27, %26 : vector<8x32xf32>
    %29 = vector.extract_strided_slice %23 {offsets = [0, 1], sizes = [8, 1], strides = [1, 1]} : vector<8x128xf32> to vector<8x1xf32>
    %30 = vector.extract_strided_slice %6 {offsets = [0, 32], sizes = [8, 32], strides = [1, 1]} : vector<8x96xf32> to vector<8x32xf32>
    %31 = vector.broadcast %29 : vector<8x1xf32> to vector<8x32xf32>
    %32 = arith.mulf %31, %30 : vector<8x32xf32>
    %33 = arith.addf %28, %32 : vector<8x32xf32>
    %34 = vector.extract_strided_slice %23 {offsets = [0, 2], sizes = [8, 1], strides = [1, 1]} : vector<8x128xf32> to vector<8x1xf32>
    %35 = vector.extract_strided_slice %6 {offsets = [0, 64], sizes = [8, 32], strides = [1, 1]} : vector<8x96xf32> to vector<8x32xf32>
    %36 = vector.broadcast %34 : vector<8x1xf32> to vector<8x32xf32>
    %37 = arith.mulf %36, %35 : vector<8x32xf32>
    %38 = arith.addf %33, %37 : vector<8x32xf32>
    %c0_15 = arith.constant 0 : index
    %c0_16 = arith.constant 0 : index
    %39 = vector.load %arg6[%c0_15, %c0_16] : memref<32x32xf32, #tpu.memory_space<vmem>>, vector<32x32xf32>
    %cst_17 = arith.constant dense<0.000000e+00> : vector<8x32xf32>
    %40 = tpu.matmul %38, %39, %cst_17 {dimension_numbers = #tpu.dot_dimension_numbers<[1], [0], [0], [1], [0, 0, 1, 1], [], []>} : vector<8x32xf32>, vector<32x32xf32>, vector<8x32xf32> -> vector<8x32xf32>
    %c0_18 = arith.constant 0 : index
    %c0_19 = arith.constant 0 : index
    %41 = vector.load %arg7[%c0_18, %c0_19] : memref<1x32xf32, #tpu.memory_space<vmem>>, vector<1x32xf32>
    %42 = vector.broadcast %41 : vector<1x32xf32> to vector<8x32xf32>
    %43 = arith.addf %40, %42 : vector<8x32xf32>
    %cst_20 = arith.constant 0.000000e+00 : f32
    %44 = vector.broadcast %cst_20 : f32 to vector<8x32xf32>
    %45 = arith.maximumf %43, %44 : vector<8x32xf32>
    %c0_21 = arith.constant 0 : index
    %c0_22 = arith.constant 0 : index
    %46 = vector.load %arg8[%c0_21, %c0_22] : memref<32x128xf32, #tpu.memory_space<vmem>>, vector<32x128xf32>
    %cst_23 = arith.constant dense<0.000000e+00> : vector<8x128xf32>
    %47 = tpu.matmul %45, %46, %cst_23 {dimension_numbers = #tpu.dot_dimension_numbers<[1], [0], [0], [1], [0, 0, 1, 1], [], []>} : vector<8x32xf32>, vector<32x128xf32>, vector<8x128xf32> -> vector<8x128xf32>
    %c0_24 = arith.constant 0 : index
    %c0_25 = arith.constant 0 : index
    %48 = vector.load %arg9[%c0_24, %c0_25] : memref<1x128xf32, #tpu.memory_space<vmem>>, vector<1x128xf32>
    %49 = vector.broadcast %48 : vector<1x128xf32> to vector<8x128xf32>
    %50 = arith.addf %47, %49 : vector<8x128xf32>
    %c0_26 = arith.constant 0 : index
    %c0_27 = arith.constant 0 : index
    %51 = vector.load %arg10[%c0_26, %c0_27] : memref<8x128xf32, #tpu.memory_space<vmem>>, vector<8x128xf32>
    tpu.vector_store %arg10[%c0_26, %c0_27], %50 {strides = array<i32>} : memref<8x128xf32, #tpu.memory_space<vmem>>, vector<8x128xf32>,
    return
  }
  func.func @transform_0(%arg0: i32) -> (i32, i32) {
    %c0_i32 = arith.constant 0 : i32
    %c0_i32_0 = arith.constant 0 : i32
    return %arg0, %c0_i32 : i32, i32
  }
  func.func @transform_1(%arg0: i32) -> (i32, i32) {
    %c0_i32 = arith.constant 0 : i32
    %c0_i32_0 = arith.constant 0 : i32
    %c0_i32_1 = arith.constant 0 : i32
    return %c0_i32, %c0_i32_0 : i32, i32
  }
  func.func @transform_2(%arg0: i32) -> (i32, i32) {
    %c0_i32 = arith.constant 0 : i32
    %c0_i32_0 = arith.constant 0 : i32
    %c0_i32_1 = arith.constant 0 : i32
    return %c0_i32, %c0_i32_0 : i32, i32
  }
  func.func @transform_3(%arg0: i32) -> (i32, i32) {
    %c0_i32 = arith.constant 0 : i32
    %c0_i32_0 = arith.constant 0 : i32
    %c0_i32_1 = arith.constant 0 : i32
    return %c0_i32, %c0_i32_0 : i32, i32
  }
  func.func @transform_4(%arg0: i32) -> (i32, i32) {
    %c0_i32 = arith.constant 0 : i32
    %c0_i32_0 = arith.constant 0 : i32
    %c0_i32_1 = arith.constant 0 : i32
    return %c0_i32, %c0_i32_0 : i32, i32
  }
  func.func @transform_5(%arg0: i32) -> (i32, i32) {
    %c0_i32 = arith.constant 0 : i32
    %c0_i32_0 = arith.constant 0 : i32
    %c0_i32_1 = arith.constant 0 : i32
    return %c0_i32, %c0_i32_0 : i32, i32
  }
  func.func @transform_6(%arg0: i32) -> (i32, i32) {
    %c0_i32 = arith.constant 0 : i32
    %c0_i32_0 = arith.constant 0 : i32
    %c0_i32_1 = arith.constant 0 : i32
    return %c0_i32, %c0_i32_0 : i32, i32
  }
  func.func @transform_7(%arg0: i32) -> (i32, i32) {
    %c0_i32 = arith.constant 0 : i32
    %c0_i32_0 = arith.constant 0 : i32
    %c0_i32_1 = arith.constant 0 : i32
    return %c0_i32, %c0_i32_0 : i32, i32
  }
  func.func @transform_8(%arg0: i32) -> (i32, i32) {
    %c0_i32 = arith.constant 0 : i32
    %c0_i32_0 = arith.constant 0 : i32
    %c0_i32_1 = arith.constant 0 : i32
    return %c0_i32, %c0_i32_0 : i32, i32
  }
  func.func @transform_9(%arg0: i32) -> (i32, i32) {
    %c0_i32 = arith.constant 0 : i32
    %c0_i32_0 = arith.constant 0 : i32
    return %arg0, %c0_i32 : i32, i32
  }
  func.func @transform_10(%arg0: i32) -> (i32, i32) {
    %c0_i32 = arith.constant 0 : i32
    %c0_i32_0 = arith.constant 0 : i32
    return %arg0, %c0_i32 : i32, i32
  }
}

</mosaic_0001>

<bundles_post_ra>
// kernel: tpu_custom_call.1
= control target key start
LH: loop header
LB: loop body
LE: loop exit
PB: predicated region body
PF: predicated region fallthrough
CT: control target
= control target key end

     0   :  { %16 = vsyncpa [#allocation3], 0  ;;  %s1070_s0 = inlined_call_operand.hbm [shape: f32[8,72], index: 0, kind: input, shape index: {}]   ;;  %s1071_s1 = inlined_call_operand.hbm [shape: f32[72,192], index: 1, kind: input, shape index: {}]   ;;  %s1072_s2 = inlined_call_operand.vmem [shape: f32[1,192], index: 2, kind: input, shape index: {}]   ;;  %s1073_s3 = inlined_call_operand.hbm [shape: f32[96,128], index: 3, kind: input, shape index: {}]   ;;  %s1074_s4 = inlined_call_operand.vmem [shape: f32[1,128], index: 4, kind: input, shape index: {}]   ;;  %s1075_s5 = inlined_call_operand.hbm [shape: f32[32,32], index: 5, kind: input, shape index: {}]   ;;  %s1076_s6 = inlined_call_operand.vmem [shape: f32[1,32], index: 6, kind: input, shape index: {}]   ;;  %s1077_s7 = inlined_call_operand.hbm [shape: f32[32,128], index: 7, kind: input, shape index: {}]   ;;  %s1078_s8 = inlined_call_operand.vmem [shape: f32[1,128], index: 8, kind: input, shape index: {}]   ;;  %s1079_s9 = inlined_call_operand.hbm [shape: f32[8,128], index: 9, kind: output, shape index: {0}]   ;;  %s1080_s10 = inlined_call_operand.hbm [shape: f32[8,128], index: 10, kind: output, shape index: {1}]  }
   0x1   :  { %17 = vsyncpa [#allocation6], 0 }
   0x2   :  { %18 = vsyncpa [#allocation9], 0 }
   0x3   :  { %19 = vsyncpa [#allocation4], 0 }
   0x4   :  { %20 = vsyncpa [#allocation13], 0  ;;  %s864_s13 = smov [#allocation5]   ;;  %s700_s17 = scalar_lea.hbm %s1071_s1, 2304 }
   0x5   :  { %s36_s14 = sshll.u32 %s864_s13, 4  ;;  %p701_p0 = scmp.ne.s32.totalorder %s1071_s1, %s700_s17  ;;  %s37_s14 = int_to_ptr.vmem [resolvable:$true] %s36_s14 }
   0x6   :  { %p704_p1 = scmp.lt.u32.totalorder %s700_s17, %s1071_s1 }
   0x8   :  { %p706_p2 = pnand %p704_p1, %p701_p0 }
   0xa   :  { %709 = shalt.err (!%p706_p2)
}
   0xb   :  { %s710_s22 = scalar_lea.vmem %s37_s14, 2304  ;;  %p715_p4 = scmp.lt.s32.totalorder %s37_s14, %s37_s14 }
   0xc   :  { %p711_p3 = scmp.ne.s32.totalorder %s37_s14, %s710_s22  ;;  %p716_p5 = scmp.lt.s32.totalorder %s710_s22, %s710_s22 }
   0xe   :  { %p717_p6 = por %p716_p5, %p715_p4 }
  0x10   :  { %p718_p7 = pnand %p717_p6, %p711_p3 }
  0x12   :  { %721 = shalt.err (!%p718_p7)
}
  0x13   :  { %s865_s23 = smov 256   ;;  %s866_s24 = smov 16  }
  0x14   :  { %42 = dma.hbm_to_vmem [thread:$0]  %s1071_s1, 2304, %s37_s14, [#allocation6], %s865_s23, %s865_s23, %s866_s24  }
  0x15   :  { %s867_s27 = smov [#allocation8]   ;;  %s868_s29 = smov [#allocation2]  }
  0x16   :  { %s64_s28 = sshll.u32 %s867_s27, 4  ;;  %s27_s30 = sshll.u32 %s868_s29, 4  ;;  %s65_s28 = int_to_ptr.vmem [resolvable:$true] %s64_s28  ;;  %s28_s30 = int_to_ptr.vmem [resolvable:$true] %s27_s30 }
  0x17   :  { %s722_s13 = scalar_lea.hbm %s1075_s5, 512 }
  0x18   :  { %p723_p8 = scmp.ne.s32.totalorder %s1075_s5, %s722_s13  ;;  %p726_p9 = scmp.lt.u32.totalorder %s722_s13, %s1075_s5 }
  0x1a   :  { %p728_p10 = pnand %p726_p9, %p723_p8 }
  0x1c   :  { %731 = shalt.err (!%p728_p10)
}
  0x1d   :  { %s732_s1 = scalar_lea.vmem %s65_s28, 512  ;;  %p737_p12 = scmp.lt.s32.totalorder %s65_s28, %s65_s28 }
  0x1e   :  { %p733_p11 = scmp.ne.s32.totalorder %s65_s28, %s732_s1  ;;  %p738_p13 = scmp.lt.s32.totalorder %s732_s1, %s732_s1 }
  0x20   :  { %p739_p0 = por %p738_p13, %p737_p12 }
  0x22   :  { %p740_p1 = pnand %p739_p0, %p733_p11 }
  0x24   :  { %743 = shalt.err (!%p740_p1)
}
  0x25   :  { %s869_s14 = smov 128   ;;  %s870_s19 = smov 8  }
  0x26   :  { %70 = dma.hbm_to_vmem [thread:$0]  %s1075_s5, 512, %s65_s28, [#allocation9], %s869_s14, %s869_s14, %s870_s19  }
  0x27   :  { %s744_s24 = scalar_lea.hbm %s1070_s0, 128 }
  0x28   :  { %p745_p2 = scmp.ne.s32.totalorder %s1070_s0, %s744_s24  ;;  %p748_p3 = scmp.lt.u32.totalorder %s744_s24, %s1070_s0 }
  0x2a   :  { %p750_p4 = pnand %p748_p3, %p745_p2 }
  0x2c   :  { %753 = shalt.err (!%p750_p4)
}
  0x2d   :  { %s754_s11 = scalar_lea.vmem %s28_s30, 128  ;;  %p759_p6 = scmp.lt.s32.totalorder %s28_s30, %s28_s30 }
  0x2e   :  { %p755_p5 = scmp.ne.s32.totalorder %s28_s30, %s754_s11  ;;  %p760_p7 = scmp.lt.s32.totalorder %s754_s11, %s754_s11 }
  0x30   :  { %p761_p8 = por %p760_p7, %p759_p6 }
  0x32   :  { %p762_p9 = pnand %p761_p8, %p755_p5 }
  0x34   :  { %765 = shalt.err (!%p762_p9)
}
  0x35   :  { %30 = dma.hbm_to_vmem [thread:$0]  %s1070_s0, 128, %s28_s30, [#allocation3]  }
  0x36   :  { %s871_s12 = smov [#allocation7]   ;;  %s872_s15 = smov [#allocation10]  }
  0x37   :  { %s50_s13 = sshll.u32 %s871_s12, 4  ;;  %s78_s16 = sshll.u32 %s872_s15, 4  ;;  %s51_s13 = int_to_ptr.vmem [resolvable:$true] %s50_s13  ;;  %s79_s16 = int_to_ptr.vmem [resolvable:$true] %s78_s16 }
  0x38   :  { %s766_s1 = scalar_lea.hbm %s1073_s3, 1536 }
  0x39   :  { %p767_p10 = scmp.ne.s32.totalorder %s1073_s3, %s766_s1  ;;  %p770_p11 = scmp.lt.u32.totalorder %s766_s1, %s1073_s3 }
  0x3b   :  { %p772_p12 = pnand %p770_p11, %p767_p10 }
  0x3d   :  { %775 = shalt.err (!%p772_p12)
}
  0x3e   :  { %s776_s0 = scalar_lea.vmem %s51_s13, 1536  ;;  %p781_p0 = scmp.lt.s32.totalorder %s51_s13, %s51_s13 }
  0x3f   :  { %p777_p13 = scmp.ne.s32.totalorder %s51_s13, %s776_s0  ;;  %p782_p1 = scmp.lt.s32.totalorder %s776_s0, %s776_s0 }
  0x41   :  { %p783_p2 = por %p782_p1, %p781_p0 }
  0x43   :  { %p784_p3 = pnand %p783_p2, %p777_p13 }
  0x45   :  { %787 = shalt.err (!%p784_p3)
}
  0x46   :  { %56 = dma.hbm_to_vmem [thread:$0]  %s1073_s3, 1536, %s51_s13, [#allocation6], %s869_s14, %s869_s14, %s870_s19  }
  0x47   :  { %s788_s27 = scalar_lea.hbm %s1077_s7, 512 }
  0x48   :  { %p789_p4 = scmp.ne.s32.totalorder %s1077_s7, %s788_s27  ;;  %p792_p5 = scmp.lt.u32.totalorder %s788_s27, %s1077_s7 }
  0x4a   :  { %p794_p6 = pnand %p792_p5, %p789_p4 }
  0x4c   :  { %797 = shalt.err (!%p794_p6)
}
  0x4d   :  { %s798_s12 = scalar_lea.vmem %s79_s16, 512  ;;  %p803_p8 = scmp.lt.s32.totalorder %s79_s16, %s79_s16 }
  0x4e   :  { %p799_p7 = scmp.ne.s32.totalorder %s79_s16, %s798_s12  ;;  %p804_p9 = scmp.lt.s32.totalorder %s798_s12, %s798_s12 }
  0x50   :  { %p805_p10 = por %p804_p9, %p803_p8 }
  0x52   :  { %p806_p11 = pnand %p805_p10, %p799_p7 }
  0x54   :  { %809 = shalt.err (!%p806_p11)
}
  0x55   :  { %84 = dma.hbm_to_vmem [thread:$0]  %s1077_s7, 512, %s79_s16, [#allocation9], %s869_s14, %s869_s14, %s870_s19  }
  0x56   :  { %854 = dma.done.wait [#allocation3], 128  }
  0x57   :  { %855 = vsyncadd [#allocation3], 4294967168 }
  0x58   :  { %856 = dma.done.wait [#allocation6], 3840  }
  0x59   :  { %857 = vsyncadd [#allocation6], 4294963456 }
  0x5a   :  { %858 = dma.done.wait [#allocation9], 1024  }
  0x5b   :  { %859 = vsyncadd [#allocation9], 4294966272  ;;  %v873_v0 = vmov 0.0   ;;  %v104_v1 = vld [vmem:[#allocation5 + $0x8] sm:$0xff]  ;;  %v106_v2 = vld [vmem:[#allocation5 + $0x18] sm:$0xff]  ;;  %vm133_vm0 = vcmask 588800   ;;  %v123_v44 = vlaneseq }
  0x5c   :  { %201 = vmatprep.mubr.f32.mxu0 %v873_v0  ;;  %v103_v3 = vld [vmem:[#allocation5] sm:$0xff]  ;;  %v626_v4 = vpack.c.bf16 %v106_v2, %v104_v1  ;;  %v105_v5 = vld [vmem:[#allocation5 + $0x10] sm:$0xff]  ;;  %v108_v6 = vld [vmem:[#allocation5 + $0x28] sm:$0xff]  ;;  %v874_v31 = vmov 0.0|0.0   ;;  %vm875_vm1 = vmmov 0   ;;  %vm235_vm2 = vcmask 261120  }
  0x5d   :  { %v110_v7 = vld [vmem:[#allocation5 + $0x38] sm:$0xff]  ;;  %v628_v8 = vpack.c.bf16 %v105_v5, %v103_v3  ;;  %v107_v10 = vld [vmem:[#allocation5 + $0x20] sm:$0xff]  ;;  %v109_v11 = vld [vmem:[#allocation5 + $0x30] sm:$0xff]  ;;  %642 = vmatprep.subr.bf16.mxu1 %v874_v31  ;;  %v124_v45 = vshrl.u32 %v123_v44, 7  ;;  %601 = vmatprep.mubr.msk.f32.mxu1 %vm875_vm1, %v873_v0  ;;  %vm237_vm3 = vcmask 785408   ;;  %s881_s16 = smov 96  }
  0x5e   :  { %v630_v9 = vpack.c.bf16 %v110_v7, %v108_v6  ;;  %v112_v12 = vld [vmem:[#allocation5 + $0x48] sm:$0xff]  ;;  %627 = vmatprep.subr.bf16.mxu0 %v626_v4  ;;  %v114_v13 = vld [vmem:[#allocation5 + $0x58] sm:$0xff]  ;;  %v632_v14 = vpack.c.bf16 %v109_v11, %v107_v10  ;;  %v111_v16 = vld [vmem:[#allocation5 + $0x40] sm:$0xff]  ;;  %s882_s1 = smov [#allocation12]  }
  0x5f   :  { %629 = vmatpush1.bf16.msra.mxu0 %v628_v8  ;;  %v634_v15 = vpack.c.bf16 %v114_v13, %v112_v12  ;;  %v113_v17 = vld [vmem:[#allocation5 + $0x50] sm:$0xff]  ;;  %v116_v18 = vld [vmem:[#allocation5 + $0x68] sm:$0xff]  ;;  %v118_v19 = vld [vmem:[#allocation5 + $0x78] sm:$0xff]  ;;  %v125_v49 = vsub.s32 0, %v124_v45  ;;  %v129_v51 = vsub.s32 1, %v124_v45  ;;  %v877_v8 = vmov 2  }
  0x60   :  { %631 = vmatprep.subr.bf16.mxu0 %v630_v9  ;;  %v636_v20 = vpack.c.bf16 %v113_v17, %v111_v16  ;;  %v638_v21 = vpack.c.bf16 %v118_v19, %v116_v18  ;;  %v115_v22 = vld [vmem:[#allocation5 + $0x60] sm:$0xff]  ;;  %v117_v23 = vld [vmem:[#allocation5 + $0x70] sm:$0xff]  ;;  %v120_v25 = vld [vmem:[#allocation5 + $0x88] sm:$0xff]  ;;  %693 = vset.pattern.permute.xlu1 %v877_v8  ;;  %v878_v9 = vmov 1   ;;  %v879_v12 = vmov 0   ;;  %s532_s20 = sshll.u32 %s882_s1, 4  ;;  %s533_s20 = int_to_ptr.vmem [resolvable:$true] %s532_s20 }
  0x61   :  { %v640_v24 = vpack.c.bf16 %v117_v23, %v115_v22  ;;  %v119_v26 = vld [vmem:[#allocation5 + $0x80] sm:$0xff]  ;;  %v102_v27 = vld [vmem:[#allocation2] sm:$0xff]  ;;  %v210_v28 = vld [vmem:[#allocation7] sm:$0xff]  ;;  %692 = vset.pattern.permute.xlu0 %v878_v9  ;;  %s810_s21 = scalar_lea.vmem %s533_s20, 128  ;;  %p815_p13 = scmp.lt.s32.totalorder %s533_s20, %s533_s20 }
  0x62   :  { %v211_v29 = vld [vmem:[#allocation7 + $0x8] sm:$0xff]  ;;  %v212_v30 = vld [vmem:[#allocation7 + $0x10] sm:$0xff]  ;;  %v213_v33 = vld [vmem:[#allocation7 + $0x18] sm:$0xff]  ;;  %p811_p12 = scmp.ne.s32.totalorder %s533_s20, %s810_s21  ;;  %p816_p0 = scmp.lt.s32.totalorder %s810_s21, %s810_s21 }
  0x63   :  { %633 = vmatpush1.bf16.msra.mxu0 %v632_v14  ;;  %v643_v32 = vpack.c.bf16 %v211_v29, %v210_v28  ;;  %v646_v34 = vpack.c.bf16 %v213_v33, %v212_v30  ;;  %v214_v35 = vld [vmem:[#allocation7 + $0x20] sm:$0xff]  ;;  %v215_v36 = vld [vmem:[#allocation7 + $0x28] sm:$0xff]  ;;  %v216_v38 = vld [vmem:[#allocation7 + $0x30] sm:$0xff] }
  0x64   :  { %635 = vmatprep.subr.bf16.mxu0 %v634_v15  ;;  %v649_v37 = vpack.c.bf16 %v215_v36, %v214_v35  ;;  %v217_v39 = vld [vmem:[#allocation7 + $0x38] sm:$0xff]  ;;  %v218_v41 = vld [vmem:[#allocation7 + $0x40] sm:$0xff]  ;;  %v219_v42 = vld [vmem:[#allocation7 + $0x48] sm:$0xff]  ;;  %p817_p1 = por %p816_p0, %p815_p13 }
  0x65   :  { %644 = vmatpush3.bf16.msra.mxu1 %v643_v32  ;;  %v652_v40 = vpack.c.bf16 %v217_v39, %v216_v38  ;;  %v655_v43 = vpack.c.bf16 %v219_v42, %v218_v41  ;;  %v220_v46 = vld [vmem:[#allocation7 + $0x50] sm:$0xff]  ;;  %v221_v47 = vld [vmem:[#allocation7 + $0x58] sm:$0xff]  ;;  %v121_v50 = vld [vmem:[%s1072_s2] sm:$0x3]  ;;  %s876_s2 = smov 32  }
  0x66   :  { %645 = vmatprep.subr.bf16.mxu1 %v874_v31  ;;  %v658_v48 = vpack.c.bf16 %v221_v47, %v220_v46  ;;  %v126_v52 = vrot.slane %v121_v50, %v125_v49  ;;  %v130_v53 = vrot.slane %v121_v50, %v129_v51  ;;  %v548_v63 = vld [vmem:[%s1074_s4] ss:$0 sm:$0xff]  ;;  %v346_v13 = vld [vmem:[#allocation8] sm:$0xff]  ;;  %v348_v16 = vld [vmem:[#allocation8 + $0x10] sm:$0xff]  ;;  %s880_s4 = smov 64   ;;  %p818_p2 = pnand %p817_p1, %p811_p12 }
  0x67   :  { %637 = vmatpush1.bf16.msra.mxu0 %v636_v20  ;;  %v347_v14 = vld [vmem:[#allocation8 + $0x8] sm:$0xff]  ;;  %v349_v17 = vld [vmem:[#allocation8 + $0x18] sm:$0xff]  ;;  %v431_v19 = vld [vmem:[#allocation10] sm:$0xff] }
  0x68   :  { %639 = vmatprep.subr.bf16.mxu0 %v638_v21  ;;  %v661_v15 = vpack.c.bf16 %v347_v14, %v346_v13  ;;  %v664_v18 = vpack.c.bf16 %v349_v17, %v348_v16  ;;  %v432_v20 = vld [vmem:[#allocation10 + $0x8] sm:$0xff]  ;;  %v434_v33 = vld [vmem:[#allocation10 + $0x18] sm:$0xff] }
  0x69   :  { %647 = vmatpush3.bf16.msra.mxu1 %v646_v34  ;;  %v667_v21 = vpack.c.bf16 %v432_v20, %v431_v19  ;;  %v550_v35 = vld [vmem:[%s1076_s6] ss:$0 sm:$0xff] }
  0x6a   :  { %648 = vmatprep.subr.bf16.mxu1 %v874_v31 }
  0x6b   :  { %641 = vmatpush1.bf16.msra.mxu0 %v640_v24 }
  0x6c   :  { %153 = vmatprep.subr.mxu0 %v120_v25 }
  0x6d   :  { %650 = vmatpush3.bf16.msra.mxu1 %v649_v37 }
  0x6e   :  { %651 = vmatprep.subr.bf16.mxu1 %v874_v31 }
  0x6f   :  { %154 = vmatpush1.msra.mxu0 %v119_v26 }
  0x70   :  { %547 = vmatmul.mubr.msk.f32.vlgmr.msra.gmra.mrb[0].mxu0 %vm133_vm0, %v102_v27  ;;  %660 = vmatprep.subr.bf16.mxu0 %v874_v31 }
  0x71   :  { %653 = vmatpush3.bf16.msra.mxu1 %v652_v40  ;;  %612 = vmatprep.mubr.msk.f32.mxu0 %vm875_vm1, %v873_v0 }
  0x72   :  { %654 = vmatprep.subr.bf16.mxu1 %v874_v31  ;;  %662 = vmatpush3.bf16.msra.mxu0 %v661_v15 }
  0x73   :  { %663 = vmatprep.subr.bf16.mxu0 %v874_v31 }
  0x75   :  { %656 = vmatpush3.bf16.msra.mxu1 %v655_v43 }
  0x76   :  { %657 = vmatprep.subr.bf16.mxu1 %v874_v31  ;;  %665 = vmatpush3.bf16.msra.mxu0 %v664_v18 }
  0x79   :  { %659 = vmatpush3.bf16.msra.mxu1 %v658_v48 }
  0x7a   :  { %666 = vmatprep.subr.bf16.mxu1 %v874_v31 }
 0x143   :  { %v203_v54 = vpop.f32.mrb[0].mxu0 }
 0x144   :  { %v1024_v55 = vadd.f32 %v203_v54, %v126_v52  ;;  %v205_v56 = vpop.f32.mrb[1].mxu0 }
 0x145   :  { %v206_v57 = vadd.f32 %v205_v56, %v130_v53 }
 0x146   :  { %v208_v58 = vmax.f32 %v1024_v55, 0.0 }
 0x147   :  { %v209_v59 = vmax.f32 %v206_v57, 0.0 }
 0x148   :  { %231 = vrot.lane.b32.xlu0 %v208_v58, %s876_s2 }
 0x14c   :  { %233 = vrot.lane.b32.xlu0 %v209_v59, %s876_s2 }
 0x1ba   :  { %v232_v60 = vpop.permute.xlu0 %231 }
 0x1be   :  { %v234_v61 = vpop.permute.xlu0 %233 }
 0x1bf   :  { %v236_v62 = vsel %vm235_vm2, %v232_v60, %v234_v61 }
 0x1c0   :  { %602 = vmatmul.mubr.msk.f32.vlgmr.msra.gmra.mrb[0].mxu1 %vm237_vm3, %v236_v62 }
 0x1c1   :  { %623 = vmatprep.mubr.msk.f32.mxu1 %vm875_vm1, %v873_v0  ;;  %668 = vmatpush3.bf16.msra.mxu1 %v667_v21 }
 0x1c2   :  { %669 = vmatprep.subr.bf16.mxu1 %v874_v31  ;;  %v433_v31 = vld [vmem:[#allocation10 + $0x10] sm:$0xff] }
 0x1c3   :  { %v670_v34 = vpack.c.bf16 %v434_v33, %v433_v31 }
 0x1c5   :  { %671 = vmatpush3.bf16.msra.mxu1 %v670_v34 }
 0x293   :  { %v306_v1 = vpop.f32.mrb[0].mxu1 }
 0x294   :  { %v307_v2 = vadd.f32 %v548_v63, %v306_v1  ;;  %v603_v3 = vpop.f32.mrb[1].mxu1 }
 0x296   :  { %310 = vmax.xlane.f32.xlu1 %v307_v2 }
 0x323   :  { %v311_v4 = vpop.xlane.xlu1 %310 }
 0x324   :  { %v312_v5 = vsub.f32 %v307_v2, %v311_v4 }
 0x326   :  { %v313_v6 = vmul.f32 1.442695, %v312_v5 }
 0x328   :  { %696 = vpow2.f32 %v313_v6 }
 0x332   :  { %v697_v7 = vpop.eup %696 }
 0x333   :  { %315 = vadd.xlane.f32.xlu1 %v697_v7 }
 0x3c0   :  { %v316_v10 = vpop.xlane.xlu1 %315 }
 0x3c1   :  { %698 = vrcp.f32 %v316_v10 }
 0x3cb   :  { %v699_v0 = vpop.eup %698 }
 0x3cc   :  { %v318_v11 = vmul.f32 %v699_v0, %v697_v7 }
 0x3ce   :  { %337 = vperm.xlu1 %693, %v318_v11   ;;  %319 = vst [vmem:[#allocation12] sm:$0xff] %v318_v11  ;;  %327 = vperm.xlu0 %692, %v318_v11  }
 0x3d2   :  { %694 = vset.pattern.permute.xlu0 %v879_v12 }
 0x3d3   :  { %322 = vperm.xlu0 %694, %v318_v11  }
 0x3d7   :  { %695 = vset.pattern.permute.xlu0 %v877_v8 }
 0x44d   :  { %v338_v22 = vpop.permute.xlu1 %337  ;;  %v328_v23 = vpop.permute.xlu0 %327 }
 0x44e   :  { %v340_v24 = vmul.f32 %v338_v22, %v1024_v55  ;;  %v330_v25 = vmul.f32 %v328_v23, %v1024_v55 }
 0x450   :  { %342 = vrot.lane.b32.xlu1 %v340_v24, %s880_s4  ;;  %332 = vrot.lane.b32.xlu0 %v330_v25, %s881_s16 }
 0x452   :  { %v323_v26 = vpop.permute.xlu0 %322 }
 0x453   :  { %v325_v27 = vmul.f32 %v323_v26, %v1024_v55 }
 0x4c2   :  { %v333_v28 = vpop.permute.xlu0 %332  ;;  %v343_v30 = vpop.permute.xlu1 %342 }
 0x4c3   :  { %v335_v29 = vadd.f32 %v333_v28, %v325_v27 }
 0x4c5   :  { %v345_v32 = vadd.f32 %v343_v30, %v335_v29 }
 0x4c7   :  { %613 = vmatmul.mubr.msk.f32.vlgmr.msra.gmra.mrb[2].mxu0 %vm235_vm2, %v345_v32 }
 0x59a   :  { %v426_v36 = vpop.f32.mrb[2].mxu0 }
 0x59b   :  { %v427_v37 = vadd.f32 %v550_v35, %v426_v36  ;;  %v614_v38 = vpop.f32.mrb[3].mxu0 }
 0x59d   :  { %v430_v39 = vmax.f32 %v427_v37, 0.0 }
 0x59f   :  { %624 = vmatmul.mubr.msk.f32.vlgmr.msra.gmra.mrb[2].mxu1 %vm235_vm2, %v430_v39 }
 0x5a0   :  { %821 = shalt.err (!%p818_p2)
}
 0x5a1   :  { %s822_s6 = scalar_lea.hbm %s1080_s10, 128 }
 0x5a2   :  { %p823_p3 = scmp.ne.s32.totalorder %s1080_s10, %s822_s6  ;;  %p826_p4 = scmp.lt.u32.totalorder %s822_s6, %s1080_s10 }
 0x5a4   :  { %p828_p5 = pnand %p826_p4, %p823_p3 }
 0x5a6   :  { %831 = shalt.err (!%p828_p5)
}
 0x5a7   :  { %535 = dma.vmem_to_hbm [thread:$0]  %s533_s20, 128, %s1080_s10, [#allocation13]   ;;  %v552_v40 = vld [vmem:[%s1078_s8] ss:$0 sm:$0xff] }
 0x5a8   :  { %s883_s5 = smov [#allocation11]  }
 0x5a9   :  { %s522_s28 = sshll.u32 %s883_s5, 4  ;;  %s523_s28 = int_to_ptr.vmem [resolvable:$true] %s522_s28 }
 0x5aa   :  { %s832_s12 = scalar_lea.vmem %s523_s28, 128  ;;  %p837_p7 = scmp.lt.s32.totalorder %s523_s28, %s523_s28 }
 0x5ab   :  { %p833_p6 = scmp.ne.s32.totalorder %s523_s28, %s832_s12  ;;  %p838_p8 = scmp.lt.s32.totalorder %s832_s12, %s832_s12 }
 0x5ad   :  { %p839_p9 = por %p838_p8, %p837_p7 }
 0x5af   :  { %p840_p10 = pnand %p839_p9, %p833_p6 }
 0x672   :  { %v511_v41 = vpop.f32.mrb[2].mxu1 }
 0x673   :  { %v512_v42 = vadd.f32 %v552_v40, %v511_v41  ;;  %v625_v43 = vpop.f32.mrb[3].mxu1 }
 0x675   :  { %515 = vst [vmem:[#allocation11] sm:$0xff] %v512_v42 }
 0x676   :  { %843 = shalt.err (!%p840_p10)
}
 0x677   :  { %s844_s13 = scalar_lea.hbm %s1079_s9, 128 }
 0x678   :  { %p845_p11 = scmp.ne.s32.totalorder %s1079_s9, %s844_s13  ;;  %p848_p12 = scmp.lt.u32.totalorder %s844_s13, %s1079_s9 }
 0x67a   :  { %p850_p13 = pnand %p848_p12, %p845_p11 }
 0x67c   :  { %853 = shalt.err (!%p850_p13)
}
 0x67d   :  { %525 = dma.vmem_to_hbm [thread:$0]  %s523_s28, 128, %s1079_s9, [#allocation4]  }
 0x67e   :  { %860 = dma.done.wait [#allocation4], 128  }
 0x67f   :  { %861 = vsyncadd [#allocation4], 4294967168 }
 0x680   :  { %862 = dma.done.wait [#allocation13], 128  }
 0x681   :  { %863 = vsyncadd [#allocation13], 4294967168 }
 0x682   :  { %542 = vsyncpa [#allocation3], 1 }
 0x683   :  { %543 = vsyncpa [#allocation6], 1 }
 0x684   :  { %544 = vsyncpa [#allocation9], 1 }
 0x685   :  { %545 = vsyncpa [#allocation4], 1 }
 0x686   :  { %546 = vsyncpa [#allocation13], 1 }

</bundles_post_ra>
